<compile_context>
chip_gen: v5e
topology: v5e:2x2
jax: 0.10.0
libtpu: 0.0.40
codegen_flags: <defaults>
</compile_context>

<pallas_src>
import jax
import jax.numpy as jnp
from jax.experimental import pallas as pl
from jax.experimental.pallas import tpu as pltpu

_LANE = 128


def _round_up(x, m):
    return ((x + m - 1) // m) * m


def _tpu_chip_info():
    """Returns (vmem_capacity_bytes, has_bf16_vpu) with safe fallbacks."""
    vmem = 128 * 2 ** 20
    try:
        vmem = int(pltpu.get_tpu_info().vmem_capacity_bytes)
    except Exception:
        pass
    kind = ""
    try:
        kind = jax.devices()[0].device_kind.lower()
    except Exception:
        pass
    # bf16 VPU ALUs exist on v6e/v7x; v5e/v5p/v4 and older take the f32 path.
    has_bf16_vpu = not any(t in kind for t in ("v2", "v3", "v4", "v5"))
    return vmem, has_bf16_vpu


def _make_mlp_kernel(num_layers, relu_before, compute_dtype, act_dtype):
    """Fused kernel body: (x, w1, b1, ..., wN, bN, out) -> out."""

    def kernel(x_ref, *refs):
        out_ref = refs[-1]
        param_refs = refs[:-1]
        h = x_ref[...].astype(act_dtype)
        for i in range(num_layers):
            w_ref = param_refs[2 * i]
            b_ref = param_refs[2 * i + 1]
            if relu_before[i]:
                h = jnp.maximum(h, 0)
            acc = jnp.dot(h.astype(compute_dtype), w_ref[...],
                          preferred_element_type=jnp.float32)
            h = (acc + b_ref[...].astype(jnp.float32)).astype(act_dtype)
        out_ref[...] = h.astype(out_ref.dtype)

    return kernel


def prepare_mlp_params(params, compute_dtype=jnp.bfloat16):
    """Pad + downcast all weights/biases ONCE to lane-dense blocks.

    params: list of (w [din, dout], b [dout] or [1, dout]) in f32.
    The returned dict is reused across forward calls so repeated inference does
    not re-allocate / re-cast the parameter set in HBM every step.
    """
    dims = [int(params[0][0].shape[0])] + [int(w.shape[1]) for w, _ in params]
    dims_p = [_round_up(d, _LANE) for d in dims]
    padded = []
    for li, (w, b) in enumerate(params):
        din, dout = int(w.shape[0]), int(w.shape[1])
        dip, dop = dims_p[li], dims_p[li + 1]
        w_p = jnp.zeros((dip, dop), compute_dtype).at[:din, :dout].set(
            w.astype(compute_dtype))
        b_p = jnp.zeros((1, dop), compute_dtype).at[:, :dout].set(
            jnp.reshape(b, (1, dout)).astype(compute_dtype))
        padded.append((w_p, b_p))
    return dict(dims=dims, dims_p=dims_p, padded=padded,
                compute_dtype=compute_dtype)


def _pick_batch_tile(B, batch_tile):
    if batch_tile is not None:
        # Enforce the (8,128) sublane constraint / unmasked-store fast path.
        return max(8, _round_up(int(batch_tile), 8))
    if B >= 32:
        # >= 4 grid steps: 2 per v7x TensorCore so input/output DMAs
        # double-buffer behind the previous step's matmuls; cap at the 256
        # MXU edge (M=128 tiles lose nothing on the MXU).
        return min(256, _round_up(-(-B // 4), 8))
    return _round_up(max(B, 1), 8)


def _fused_group(x_pad, group_params, dims_p, relu_before, tb, out_dtype,
                 compute_dtype, act_dtype, vmem_cap):
    """One fused pallas_call over a group of consecutive layers.

    x_pad: [B_pad, dims_p[0]] already lane-padded, dtype == compute_dtype.
    Returns padded output [B_pad, dims_p[-1]] in out_dtype.
    """
    B_pad = x_pad.shape[0]
    num_layers = len(dims_p) - 1
    kernel = _make_mlp_kernel(num_layers, relu_before, compute_dtype, act_dtype)

    flat = []
    for w_p, b_p in group_params:
        flat.extend([w_p, b_p])

    param_bytes = sum(int(p.size) * p.dtype.itemsize for p in flat)
    act_itemsize = max(jnp.dtype(act_dtype).itemsize, 4)
    in_tile = tb * dims_p[0] * x_pad.dtype.itemsize
    out_tile = tb * dims_p[-1] * jnp.dtype(out_dtype).itemsize
    work = tb * max(dims_p) * act_itemsize

    flops = 2 * B_pad * sum(dims_p[i] * dims_p[i + 1] for i in range(num_layers))
    bytes_accessed = (B_pad * dims_p[0] * x_pad.dtype.itemsize
                      + B_pad * dims_p[-1] * jnp.dtype(out_dtype).itemsize
                      + param_bytes)
    cost = pl.CostEstimate(flops=flops, transcendentals=0,
                           bytes_accessed=bytes_accessed)

    def build(single_buffer_params):
        # Constant-index weight/bias blocks never change across the grid, so a
        # single VMEM buffer suffices; double-buffering them only doubles the
        # resident footprint.
        kw = dict(pipeline_mode=pl.Buffered(1)) if single_buffer_params else {}
        in_specs = [pl.BlockSpec((tb, dims_p[0]), lambda i: (i, 0))]
        for li in range(num_layers):
            dip, dop = dims_p[li], dims_p[li + 1]
            in_specs.append(pl.BlockSpec((dip, dop), lambda i: (0, 0), **kw))
            in_specs.append(pl.BlockSpec((1, dop), lambda i: (0, 0), **kw))
        out_specs = pl.BlockSpec((tb, dims_p[-1]), lambda i: (i, 0))

        pbuf = 1 if single_buffer_params else 2
        need = (pbuf * param_bytes + 2 * (in_tile + out_tile) + 6 * work
                + (4 << 20))
        vmem_limit = int(min(max(need, 16 << 20), int(0.9 * vmem_cap)))

        return pl.pallas_call(
            kernel,
            out_shape=jax.ShapeDtypeStruct((B_pad, dims_p[-1]), out_dtype),
            grid=(B_pad // tb,),
            in_specs=in_specs,
            out_specs=out_specs,
            compiler_params=pltpu.CompilerParams(
                dimension_semantics=("parallel",),
                vmem_limit_bytes=vmem_limit),
            cost_estimate=cost,
        )

    try:
        return build(True)(x_pad, *flat)
    except Exception:
        # Fallback if this JAX build rejects single-buffered constant blocks.
        return build(False)(x_pad, *flat)


def mlp_forward(x, params=None, *, prepared=None, final_relu=False,
                batch_tile=None, compute_dtype=jnp.bfloat16, out_dtype=None):
    """MLP forward pass as (one or a few) fused Pallas calls.

    x:        [B, D0]
    params:   list of (w_i [D_{i-1}, D_i], b_i [1, D_i]) — padded on the fly, OR
    prepared: result of prepare_mlp_params(params) — padding cached across calls.
    """
    if prepared is None:
        if params is None:
            raise ValueError("pass either params or prepared")
        prepared = prepare_mlp_params(params, compute_dtype)
    compute_dtype = prepared["compute_dtype"]
    dims, dims_p, padded = prepared["dims"], prepared["dims_p"], prepared["padded"]
    num_layers = len(padded)

    final_relu_layer = num_layers if final_relu else num_layers - 1
    relu_before = tuple(i < final_relu_layer for i in range(num_layers))

    B, D0 = x.shape
    assert D0 == dims[0], "input feature dim mismatch"
    out_dtype = x.dtype if out_dtype is None else out_dtype

    vmem_cap, has_bf16_vpu = _tpu_chip_info()
    act_dtype = compute_dtype if has_bf16_vpu else jnp.float32

    tb = _pick_batch_tile(B, batch_tile)
    B_pad = _round_up(B, tb)

    # Pad + downcast the input once; lane-dense bf16 DMA. Zero padding is
    # exact: padded rows/cols stay 0 through ReLU + zero weights + zero bias.
    x_pad = jnp.zeros((B_pad, dims_p[0]), compute_dtype).at[:B, :D0].set(
        x.astype(compute_dtype))

    # Split layers into groups whose single-buffered params fit a chip-aware
    # VMEM budget (v7x: 64 MiB VMEM; v5e/v6e: 128 MiB). Groups chain through
    # HBM in compute_dtype.
    itemsize = jnp.dtype(compute_dtype).itemsize
    budget = int(0.35 * vmem_cap)
    groups, cur, cur_bytes = [], [], 0
    for li in range(num_layers):
        lb = (dims_p[li] * dims_p[li + 1] + dims_p[li + 1]) * itemsize
        if cur and cur_bytes + lb > budget:
            groups.append(cur)
            cur, cur_bytes = [], 0
        cur.append(li)
        cur_bytes += lb
    groups.append(cur)
    # TODO(synk): a single layer whose weights alone exceed the budget still
    # needs output-feature (N) tiling as a second grid axis; it currently gets
    # its own group and relies on the compiler's VMEM limit.

    h = x_pad
    for gi, group in enumerate(groups):
        g_dims_p = [dims_p[group[0]]] + [dims_p[li + 1] for li in group]
        g_params = [padded[li] for li in group]
        g_relu = tuple(relu_before[li] for li in group)
        g_out_dtype = out_dtype if gi == len(groups) - 1 else compute_dtype
        h = _fused_group(h, g_params, g_dims_p, g_relu, tb, g_out_dtype,
                         compute_dtype, act_dtype, vmem_cap)

    return h[:B, :dims[-1]]


def init_mlp_params(key, layer_sizes):
    """Deterministic init matching nn.Linear shapes (Kaiming-uniform-like)."""
    params = []
    for i in range(len(layer_sizes) - 1):
        fan_in, fan_out = int(layer_sizes[i]), int(layer_sizes[i + 1])
        key, kw, kb = jax.random.split(key, 3)
        bound = 1.0 / jnp.sqrt(jnp.float32(fan_in))
        # Stored as [in, out] = transpose of PyTorch's [out, in].
        w = jax.random.uniform(kw, (fan_in, fan_out), jnp.float32,
                               minval=-bound, maxval=bound)
        b = jax.random.uniform(kb, (1, fan_out), jnp.float32,
                               minval=-bound, maxval=bound)
        params.append((w, b))
    return params


def mlp_reference(x, params, *, final_relu=False, compute_dtype=None,
                  act_dtype=jnp.float32):
    """Pure-JAX reference with the same layer ordering.

    compute_dtype=None  -> exact f32 PyTorch semantics.
    compute_dtype=bf16  -> mirrors the kernel's bf16-operand / f32-accum math,
                           carrying the activation in act_dtype between layers.
    """
    num_layers = len(params)
    final_relu_layer = num_layers if final_relu else num_layers - 1
    if compute_dtype is None:
        h = x.astype(jnp.float32)
    else:
        h = x.astype(compute_dtype).astype(act_dtype)
    for i, (w, b) in enumerate(params):
        if i < final_relu_layer:
            h = jnp.maximum(h, 0)
        if compute_dtype is None:
            h = (jnp.dot(h, w, preferred_element_type=jnp.float32)
                 + jnp.reshape(b, (1, -1)))
        else:
            acc = jnp.dot(h.astype(compute_dtype), w.astype(compute_dtype),
                          preferred_element_type=jnp.float32)
            bias = jnp.reshape(b, (1, -1)).astype(compute_dtype).astype(
                jnp.float32)
            h = (acc + bias).astype(act_dtype)
    return h.astype(x.dtype)


if __name__ == "__main__":
    key = jax.random.PRNGKey(0)

    layer_sizes = [32, 64, 48, 16]   # small demo, consistent with MLP(layer_sizes)
    batch = 8
    final_relu = False

    kx, kp = jax.random.split(key)
    x = jax.random.normal(kx, (batch, layer_sizes[0]), jnp.float32)
    params = init_mlp_params(kp, layer_sizes)

    # Pad + downcast parameters once (cached across repeated forward calls).
    prepared = prepare_mlp_params(params)
    out = mlp_forward(x, prepared=prepared, final_relu=final_relu)
    out = jax.block_until_ready(out)
    assert out.shape == (batch, layer_sizes[-1])
    assert out.dtype == x.dtype

    _, _has_bf16_vpu = _tpu_chip_info()
    _act_dtype = jnp.bfloat16 if _has_bf16_vpu else jnp.float32

    # Tight check vs a reference mirroring the kernel's bf16 math exactly.
    ref_bf16 = mlp_reference(x, params, final_relu=final_relu,
                             compute_dtype=jnp.bfloat16, act_dtype=_act_dtype)
    assert jnp.allclose(out, ref_bf16, atol=1e-2, rtol=1e-2), \
        "mismatch vs bf16-matched reference"

    # Looser check vs the exact f32 PyTorch-semantics reference.
    ref_f32 = mlp_reference(x, params, final_relu=final_relu)
    assert jnp.allclose(out, ref_f32, atol=5e-2, rtol=5e-2), \
        "mismatch vs f32 reference"

    print("KERNEL_OK")
</pallas_src>

<mosaic_0001>
module attributes {stable_mosaic.version = 11 : i64} {
  func.func @kernel(%arg0: i32, %arg1: memref<8x128xbf16, #tpu.memory_space<vmem>>, %arg2: memref<128x128xbf16, #tpu.memory_space<vmem>>, %arg3: memref<1x128xbf16, #tpu.memory_space<vmem>>, %arg4: memref<128x128xbf16, #tpu.memory_space<vmem>>, %arg5: memref<1x128xbf16, #tpu.memory_space<vmem>>, %arg6: memref<128x128xbf16, #tpu.memory_space<vmem>>, %arg7: memref<1x128xbf16, #tpu.memory_space<vmem>>, %arg8: memref<8x128xf32, #tpu.memory_space<vmem>>) attributes {dimension_semantics = [#tpu.dimension_semantics<parallel>], iteration_bounds = array<i64: 1>, scalar_prefetch = 0 : i64, scratch_operands = 0 : i64, tpu.core_type = #tpu.core_type<tc>, window_params = [{transform_indices = @transform_0, window_bounds = array<i64: 8, 128>}, {pipeline_mode = #tpu.pipeline_mode<synchronous>, transform_indices = @transform_1, window_bounds = array<i64: 128, 128>}, {pipeline_mode = #tpu.pipeline_mode<synchronous>, transform_indices = @transform_2, window_bounds = array<i64: 1, 128>}, {pipeline_mode = #tpu.pipeline_mode<synchronous>, transform_indices = @transform_3, window_bounds = array<i64: 128, 128>}, {pipeline_mode = #tpu.pipeline_mode<synchronous>, transform_indices = @transform_4, window_bounds = array<i64: 1, 128>}, {pipeline_mode = #tpu.pipeline_mode<synchronous>, transform_indices = @transform_5, window_bounds = array<i64: 128, 128>}, {pipeline_mode = #tpu.pipeline_mode<synchronous>, transform_indices = @transform_6, window_bounds = array<i64: 1, 128>}, {transform_indices = @transform_7, window_bounds = array<i64: 8, 128>}]} {
    %c0 = arith.constant 0 : index
    %c0_0 = arith.constant 0 : index
    %0 = vector.load %arg1[%c0, %c0_0] : memref<8x128xbf16, #tpu.memory_space<vmem>>, vector<8x128xbf16>
    %cst = arith.constant 0.000000e+00 : bf16
    %1 = vector.broadcast %cst : bf16 to vector<8x128xbf16>
    %2 = arith.maximumf %0, %1 : vector<8x128xbf16>
    %c0_1 = arith.constant 0 : index
    %c0_2 = arith.constant 0 : index
    %3 = vector.load %arg2[%c0_1, %c0_2] : memref<128x128xbf16, #tpu.memory_space<vmem>>, vector<128x128xbf16>
    %cst_3 = arith.constant dense<0.000000e+00> : vector<8x128xf32>
    %4 = tpu.matmul %2, %3, %cst_3 {dimension_numbers = #tpu.dot_dimension_numbers<[1], [0], [0], [1], [0, 0, 1, 1], [], []>} : vector<8x128xbf16>, vector<128x128xbf16>, vector<8x128xf32> -> vector<8x128xf32>
    %c0_4 = arith.constant 0 : index
    %c0_5 = arith.constant 0 : index
    %5 = vector.load %arg3[%c0_4, %c0_5] : memref<1x128xbf16, #tpu.memory_space<vmem>>, vector<1x128xbf16>
    %6 = arith.extf %5 : vector<1x128xbf16> to vector<1x128xf32>
    %7 = vector.broadcast %6 : vector<1x128xf32> to vector<8x128xf32>
    %8 = arith.addf %4, %7 : vector<8x128xf32>
    %9 = arith.truncf %8 : vector<8x128xf32> to vector<8x128xbf16>
    %cst_6 = arith.constant 0.000000e+00 : bf16
    %10 = vector.broadcast %cst_6 : bf16 to vector<8x128xbf16>
    %11 = arith.maximumf %9, %10 : vector<8x128xbf16>
    %c0_7 = arith.constant 0 : index
    %c0_8 = arith.constant 0 : index
    %12 = vector.load %arg4[%c0_7, %c0_8] : memref<128x128xbf16, #tpu.memory_space<vmem>>, vector<128x128xbf16>
    %cst_9 = arith.constant dense<0.000000e+00> : vector<8x128xf32>
    %13 = tpu.matmul %11, %12, %cst_9 {dimension_numbers = #tpu.dot_dimension_numbers<[1], [0], [0], [1], [0, 0, 1, 1], [], []>} : vector<8x128xbf16>, vector<128x128xbf16>, vector<8x128xf32> -> vector<8x128xf32>
    %c0_10 = arith.constant 0 : index
    %c0_11 = arith.constant 0 : index
    %14 = vector.load %arg5[%c0_10, %c0_11] : memref<1x128xbf16, #tpu.memory_space<vmem>>, vector<1x128xbf16>
    %15 = arith.extf %14 : vector<1x128xbf16> to vector<1x128xf32>
    %16 = vector.broadcast %15 : vector<1x128xf32> to vector<8x128xf32>
    %17 = arith.addf %13, %16 : vector<8x128xf32>
    %18 = arith.truncf %17 : vector<8x128xf32> to vector<8x128xbf16>
    %c0_12 = arith.constant 0 : index
    %c0_13 = arith.constant 0 : index
    %19 = vector.load %arg6[%c0_12, %c0_13] : memref<128x128xbf16, #tpu.memory_space<vmem>>, vector<128x128xbf16>
    %cst_14 = arith.constant dense<0.000000e+00> : vector<8x128xf32>
    %20 = tpu.matmul %18, %19, %cst_14 {dimension_numbers = #tpu.dot_dimension_numbers<[1], [0], [0], [1], [0, 0, 1, 1], [], []>} : vector<8x128xbf16>, vector<128x128xbf16>, vector<8x128xf32> -> vector<8x128xf32>
    %c0_15 = arith.constant 0 : index
    %c0_16 = arith.constant 0 : index
    %21 = vector.load %arg7[%c0_15, %c0_16] : memref<1x128xbf16, #tpu.memory_space<vmem>>, vector<1x128xbf16>
    %22 = arith.extf %21 : vector<1x128xbf16> to vector<1x128xf32>
    %23 = vector.broadcast %22 : vector<1x128xf32> to vector<8x128xf32>
    %24 = arith.addf %20, %23 : vector<8x128xf32>
    %25 = arith.truncf %24 : vector<8x128xf32> to vector<8x128xbf16>
    %26 = arith.extf %25 : vector<8x128xbf16> to vector<8x128xf32>
    %c0_17 = arith.constant 0 : index
    %c0_18 = arith.constant 0 : index
    %27 = vector.load %arg8[%c0_17, %c0_18] : memref<8x128xf32, #tpu.memory_space<vmem>>, vector<8x128xf32>
    tpu.vector_store %arg8[%c0_17, %c0_18], %26 {strides = array<i32>} : memref<8x128xf32, #tpu.memory_space<vmem>>, vector<8x128xf32>,
    return
  }
  func.func @transform_0(%arg0: i32) -> (i32, i32) {
    %c0_i32 = arith.constant 0 : i32
    %c0_i32_0 = arith.constant 0 : i32
    return %arg0, %c0_i32 : i32, i32
  }
  func.func @transform_1(%arg0: i32) -> (i32, i32) {
    %c0_i32 = arith.constant 0 : i32
    %c0_i32_0 = arith.constant 0 : i32
    %c0_i32_1 = arith.constant 0 : i32
    return %c0_i32, %c0_i32_0 : i32, i32
  }
  func.func @transform_2(%arg0: i32) -> (i32, i32) {
    %c0_i32 = arith.constant 0 : i32
    %c0_i32_0 = arith.constant 0 : i32
    %c0_i32_1 = arith.constant 0 : i32
    return %c0_i32, %c0_i32_0 : i32, i32
  }
  func.func @transform_3(%arg0: i32) -> (i32, i32) {
    %c0_i32 = arith.constant 0 : i32
    %c0_i32_0 = arith.constant 0 : i32
    %c0_i32_1 = arith.constant 0 : i32
    return %c0_i32, %c0_i32_0 : i32, i32
  }
  func.func @transform_4(%arg0: i32) -> (i32, i32) {
    %c0_i32 = arith.constant 0 : i32
    %c0_i32_0 = arith.constant 0 : i32
    %c0_i32_1 = arith.constant 0 : i32
    return %c0_i32, %c0_i32_0 : i32, i32
  }
  func.func @transform_5(%arg0: i32) -> (i32, i32) {
    %c0_i32 = arith.constant 0 : i32
    %c0_i32_0 = arith.constant 0 : i32
    %c0_i32_1 = arith.constant 0 : i32
    return %c0_i32, %c0_i32_0 : i32, i32
  }
  func.func @transform_6(%arg0: i32) -> (i32, i32) {
    %c0_i32 = arith.constant 0 : i32
    %c0_i32_0 = arith.constant 0 : i32
    %c0_i32_1 = arith.constant 0 : i32
    return %c0_i32, %c0_i32_0 : i32, i32
  }
  func.func @transform_7(%arg0: i32) -> (i32, i32) {
    %c0_i32 = arith.constant 0 : i32
    %c0_i32_0 = arith.constant 0 : i32
    return %arg0, %c0_i32 : i32, i32
  }
}

module attributes {stable_mosaic.version = 11 : i64} {
  func.func @kernel(%arg0: i32, %arg1: memref<8x128xbf16, #tpu.memory_space<vmem>>, %arg2: memref<128x128xbf16, #tpu.memory_space<vmem>>, %arg3: memref<1x128xbf16, #tpu.memory_space<vmem>>, %arg4: memref<128x128xbf16, #tpu.memory_space<vmem>>, %arg5: memref<1x128xbf16, #tpu.memory_space<vmem>>, %arg6: memref<128x128xbf16, #tpu.memory_space<vmem>>, %arg7: memref<1x128xbf16, #tpu.memory_space<vmem>>, %arg8: memref<8x128xf32, #tpu.memory_space<vmem>>) attributes {dimension_semantics = [#tpu.dimension_semantics<parallel>], iteration_bounds = array<i64: 1>, scalar_prefetch = 0 : i64, scratch_operands = 0 : i64, tpu.core_type = #tpu.core_type<tc>, window_params = [{transform_indices = @transform_0, window_bounds = array<i64: 8, 128>}, {pipeline_mode = #tpu.pipeline_mode<synchronous>, transform_indices = @transform_1, window_bounds = array<i64: 128, 128>}, {pipeline_mode = #tpu.pipeline_mode<synchronous>, transform_indices = @transform_2, window_bounds = array<i64: 1, 128>}, {pipeline_mode = #tpu.pipeline_mode<synchronous>, transform_indices = @transform_3, window_bounds = array<i64: 128, 128>}, {pipeline_mode = #tpu.pipeline_mode<synchronous>, transform_indices = @transform_4, window_bounds = array<i64: 1, 128>}, {pipeline_mode = #tpu.pipeline_mode<synchronous>, transform_indices = @transform_5, window_bounds = array<i64: 128, 128>}, {pipeline_mode = #tpu.pipeline_mode<synchronous>, transform_indices = @transform_6, window_bounds = array<i64: 1, 128>}, {transform_indices = @transform_7, window_bounds = array<i64: 8, 128>}]} {
    %c0 = arith.constant 0 : index
    %c0_0 = arith.constant 0 : index
    %0 = vector.load %arg1[%c0, %c0_0] : memref<8x128xbf16, #tpu.memory_space<vmem>>, vector<8x128xbf16>
    %cst = arith.constant 0.000000e+00 : bf16
    %1 = vector.broadcast %cst : bf16 to vector<8x128xbf16>
    %2 = arith.maximumf %0, %1 : vector<8x128xbf16>
    %c0_1 = arith.constant 0 : index
    %c0_2 = arith.constant 0 : index
    %3 = vector.load %arg2[%c0_1, %c0_2] : memref<128x128xbf16, #tpu.memory_space<vmem>>, vector<128x128xbf16>
    %cst_3 = arith.constant dense<0.000000e+00> : vector<8x128xf32>
    %4 = tpu.matmul %2, %3, %cst_3 {dimension_numbers = #tpu.dot_dimension_numbers<[1], [0], [0], [1], [0, 0, 1, 1], [], []>} : vector<8x128xbf16>, vector<128x128xbf16>, vector<8x128xf32> -> vector<8x128xf32>
    %c0_4 = arith.constant 0 : index
    %c0_5 = arith.constant 0 : index
    %5 = vector.load %arg3[%c0_4, %c0_5] : memref<1x128xbf16, #tpu.memory_space<vmem>>, vector<1x128xbf16>
    %6 = arith.extf %5 : vector<1x128xbf16> to vector<1x128xf32>
    %7 = vector.broadcast %6 : vector<1x128xf32> to vector<8x128xf32>
    %8 = arith.addf %4, %7 : vector<8x128xf32>
    %9 = arith.truncf %8 : vector<8x128xf32> to vector<8x128xbf16>
    %cst_6 = arith.constant 0.000000e+00 : bf16
    %10 = vector.broadcast %cst_6 : bf16 to vector<8x128xbf16>
    %11 = arith.maximumf %9, %10 : vector<8x128xbf16>
    %c0_7 = arith.constant 0 : index
    %c0_8 = arith.constant 0 : index
    %12 = vector.load %arg4[%c0_7, %c0_8] : memref<128x128xbf16, #tpu.memory_space<vmem>>, vector<128x128xbf16>
    %cst_9 = arith.constant dense<0.000000e+00> : vector<8x128xf32>
    %13 = tpu.matmul %11, %12, %cst_9 {dimension_numbers = #tpu.dot_dimension_numbers<[1], [0], [0], [1], [0, 0, 1, 1], [], []>} : vector<8x128xbf16>, vector<128x128xbf16>, vector<8x128xf32> -> vector<8x128xf32>
    %c0_10 = arith.constant 0 : index
    %c0_11 = arith.constant 0 : index
    %14 = vector.load %arg5[%c0_10, %c0_11] : memref<1x128xbf16, #tpu.memory_space<vmem>>, vector<1x128xbf16>
    %15 = arith.extf %14 : vector<1x128xbf16> to vector<1x128xf32>
    %16 = vector.broadcast %15 : vector<1x128xf32> to vector<8x128xf32>
    %17 = arith.addf %13, %16 : vector<8x128xf32>
    %18 = arith.truncf %17 : vector<8x128xf32> to vector<8x128xbf16>
    %c0_12 = arith.constant 0 : index
    %c0_13 = arith.constant 0 : index
    %19 = vector.load %arg6[%c0_12, %c0_13] : memref<128x128xbf16, #tpu.memory_space<vmem>>, vector<128x128xbf16>
    %cst_14 = arith.constant dense<0.000000e+00> : vector<8x128xf32>
    %20 = tpu.matmul %18, %19, %cst_14 {dimension_numbers = #tpu.dot_dimension_numbers<[1], [0], [0], [1], [0, 0, 1, 1], [], []>} : vector<8x128xbf16>, vector<128x128xbf16>, vector<8x128xf32> -> vector<8x128xf32>
    %c0_15 = arith.constant 0 : index
    %c0_16 = arith.constant 0 : index
    %21 = vector.load %arg7[%c0_15, %c0_16] : memref<1x128xbf16, #tpu.memory_space<vmem>>, vector<1x128xbf16>
    %22 = arith.extf %21 : vector<1x128xbf16> to vector<1x128xf32>
    %23 = vector.broadcast %22 : vector<1x128xf32> to vector<8x128xf32>
    %24 = arith.addf %20, %23 : vector<8x128xf32>
    %25 = arith.truncf %24 : vector<8x128xf32> to vector<8x128xbf16>
    %26 = arith.extf %25 : vector<8x128xbf16> to vector<8x128xf32>
    %c0_17 = arith.constant 0 : index
    %c0_18 = arith.constant 0 : index
    %27 = vector.load %arg8[%c0_17, %c0_18] : memref<8x128xf32, #tpu.memory_space<vmem>>, vector<8x128xf32>
    tpu.vector_store %arg8[%c0_17, %c0_18], %26 {strides = array<i32>} : memref<8x128xf32, #tpu.memory_space<vmem>>, vector<8x128xf32>,
    return
  }
  func.func @transform_0(%arg0: i32) -> (i32, i32) {
    %c0_i32 = arith.constant 0 : i32
    %c0_i32_0 = arith.constant 0 : i32
    return %arg0, %c0_i32 : i32, i32
  }
  func.func @transform_1(%arg0: i32) -> (i32, i32) {
    %c0_i32 = arith.constant 0 : i32
    %c0_i32_0 = arith.constant 0 : i32
    %c0_i32_1 = arith.constant 0 : i32
    return %c0_i32, %c0_i32_0 : i32, i32
  }
  func.func @transform_2(%arg0: i32) -> (i32, i32) {
    %c0_i32 = arith.constant 0 : i32
    %c0_i32_0 = arith.constant 0 : i32
    %c0_i32_1 = arith.constant 0 : i32
    return %c0_i32, %c0_i32_0 : i32, i32
  }
  func.func @transform_3(%arg0: i32) -> (i32, i32) {
    %c0_i32 = arith.constant 0 : i32
    %c0_i32_0 = arith.constant 0 : i32
    %c0_i32_1 = arith.constant 0 : i32
    return %c0_i32, %c0_i32_0 : i32, i32
  }
  func.func @transform_4(%arg0: i32) -> (i32, i32) {
    %c0_i32 = arith.constant 0 : i32
    %c0_i32_0 = arith.constant 0 : i32
    %c0_i32_1 = arith.constant 0 : i32
    return %c0_i32, %c0_i32_0 : i32, i32
  }
  func.func @transform_5(%arg0: i32) -> (i32, i32) {
    %c0_i32 = arith.constant 0 : i32
    %c0_i32_0 = arith.constant 0 : i32
    %c0_i32_1 = arith.constant 0 : i32
    return %c0_i32, %c0_i32_0 : i32, i32
  }
  func.func @transform_6(%arg0: i32) -> (i32, i32) {
    %c0_i32 = arith.constant 0 : i32
    %c0_i32_0 = arith.constant 0 : i32
    %c0_i32_1 = arith.constant 0 : i32
    return %c0_i32, %c0_i32_0 : i32, i32
  }
  func.func @transform_7(%arg0: i32) -> (i32, i32) {
    %c0_i32 = arith.constant 0 : i32
    %c0_i32_0 = arith.constant 0 : i32
    return %arg0, %c0_i32 : i32, i32
  }
}

</mosaic_0001>

<bundles_post_ra>
// kernel: tpu_custom_call.1
= control target key start
LH: loop header
LB: loop body
LE: loop exit
PB: predicated region body
PF: predicated region fallthrough
CT: control target
= control target key end

     0   :  { %12 = vsyncpa [#allocation3], 0  ;;  %s685_s0 = inlined_call_operand.hbm [shape: bf16[8,128], index: 0, kind: input, shape index: {}]   ;;  %s686_s1 = inlined_call_operand.hbm [shape: bf16[128,128], index: 1, kind: input, shape index: {}]   ;;  %s687_s2 = inlined_call_operand.vmem [shape: bf16[1,128], index: 2, kind: input, shape index: {}]   ;;  %s688_s3 = inlined_call_operand.hbm [shape: bf16[128,128], index: 3, kind: input, shape index: {}]   ;;  %s689_s4 = inlined_call_operand.vmem [shape: bf16[1,128], index: 4, kind: input, shape index: {}]   ;;  %s690_s5 = inlined_call_operand.hbm [shape: bf16[128,128], index: 5, kind: input, shape index: {}]   ;;  %s691_s6 = inlined_call_operand.vmem [shape: bf16[1,128], index: 6, kind: input, shape index: {}]   ;;  %s692_s7 = inlined_call_operand.hbm [shape: f32[8,128], index: 7, kind: output, shape index: {}]  }
   0x1   :  { %13 = vsyncpa [#allocation6], 0 }
   0x2   :  { %14 = vsyncpa [#allocation9], 0  ;;  %s31_s26 = sshll.u32 %s686_s1, 4  ;;  %s32_s26 = int_to_ptr.hbm [resolvable:$true] %s31_s26 }
   0x3   :  { %15 = vsyncpa [#allocation4], 0  ;;  %s614_s27 = smov [#allocation5]   ;;  %s21_s8 = sshll.u32 %s685_s0, 4  ;;  %s22_s8 = int_to_ptr.hbm [resolvable:$true] %s21_s8 }
   0x4   :  { %s33_s28 = sshll.u32 %s614_s27, 4  ;;  %s615_s9 = smov 64   ;;  %s34_s28 = int_to_ptr.vmem [resolvable:$true] %s33_s28 }
   0x5   :  { %s616_s10 = smov 4   ;;  %s617_s11 = smov [#allocation2]  }
   0x6   :  { %39 = dma.hbm_to_vmem [thread:$0]  %s32_s26, 1024, %s34_s28, [#allocation6], %s615_s9, %s615_s9, %s616_s10  }
   0x7   :  { %s23_s12 = sshll.u32 %s617_s11, 4  ;;  %s46_s15 = sshll.u32 %s688_s3, 4  ;;  %s24_s12 = int_to_ptr.vmem [resolvable:$true] %s23_s12  ;;  %s47_s15 = int_to_ptr.hbm [resolvable:$true] %s46_s15 }
   0x8   :  { %26 = dma.hbm_to_vmem [thread:$0]  %s22_s8, 64, %s24_s12, [#allocation3]  }
   0x9   :  { %s61_s17 = sshll.u32 %s690_s5, 4  ;;  %s618_s18 = smov [#allocation7]   ;;  %s62_s17 = int_to_ptr.hbm [resolvable:$true] %s61_s17 }
   0xa   :  { %s48_s19 = sshll.u32 %s618_s18, 4  ;;  %s619_s0 = smov [#allocation8]   ;;  %s49_s19 = int_to_ptr.vmem [resolvable:$true] %s48_s19 }
   0xb   :  { %54 = dma.hbm_to_vmem [thread:$0]  %s47_s15, 1024, %s49_s19, [#allocation6], %s615_s9, %s615_s9, %s616_s10  }
   0xc   :  { %s63_s20 = sshll.u32 %s619_s0, 4  ;;  %s64_s20 = int_to_ptr.vmem [resolvable:$true] %s63_s20 }
   0xd   :  { %69 = dma.hbm_to_vmem [thread:$0]  %s62_s17, 1024, %s64_s20, [#allocation9], %s615_s9, %s615_s9, %s616_s10  }
   0xe   :  { %606 = dma.done.wait [#allocation3], 64  }
   0xf   :  { %607 = vsyncadd [#allocation3], 4294967232 }
  0x10   :  { %608 = dma.done.wait [#allocation6], 2048  }
  0x11   :  { %609 = vsyncadd [#allocation6], 4294965248 }
  0x12   :  { %610 = dma.done.wait [#allocation9], 1024  }
  0x13   :  { %611 = vsyncadd [#allocation9], 4294966272  ;;  %v462_v0 = vld [vmem:[#allocation5 + $0x38] sm:$0xff]  ;;  %v461_v1 = vld [vmem:[#allocation5 + $0x30] sm:$0xff]  ;;  %s620_s24 = smov [#allocation10]  }
  0x14   :  { %159 = vmatpush.bf16.msra.mxu0 %v462_v0  ;;  %v470_v2 = vld [vmem:[#allocation7 + $0x38] sm:$0xff]  ;;  %v469_v3 = vld [vmem:[#allocation7 + $0x30] sm:$0xff]  ;;  %v460_v4 = vld [vmem:[#allocation5 + $0x28] sm:$0xff]  ;;  %s345_s25 = sshll.u32 %s620_s24, 4  ;;  %s346_s25 = int_to_ptr.vmem [resolvable:$true] %s345_s25 }
  0x15   :  { %243 = vmatpush.bf16.msra.mxu1 %v470_v2  ;;  %v468_v5 = vld [vmem:[#allocation7 + $0x28] sm:$0xff]  ;;  %v459_v6 = vld [vmem:[#allocation5 + $0x20] sm:$0xff]  ;;  %v458_v8 = vld [vmem:[#allocation5 + $0x18] sm:$0xff] }
  0x16   :  { %v467_v7 = vld [vmem:[#allocation7 + $0x20] sm:$0xff]  ;;  %v466_v9 = vld [vmem:[#allocation7 + $0x18] sm:$0xff]  ;;  %v457_v10 = vld [vmem:[#allocation5 + $0x10] sm:$0xff] }
  0x17   :  { %v88_v11 = vld [vmem:[#allocation2] sm:$0xf]  ;;  %v465_v13 = vld [vmem:[#allocation7 + $0x10] sm:$0xff]  ;;  %v456_v14 = vld [vmem:[#allocation5 + $0x8] sm:$0xff] }
  0x18   :  { %160 = vmatpush.bf16.msra.mxu0 %v461_v1  ;;  %v89_v12 = vunpack.c.l.bf16 %v88_v11  ;;  %v455_v16 = vld [vmem:[#allocation5] sm:$0xff]  ;;  %v464_v18 = vld [vmem:[#allocation7 + $0x8] sm:$0xff]  ;;  %v478_v20 = vld [vmem:[#allocation8 + $0x38] sm:$0xff] }
  0x19   :  { %244 = vmatpush.bf16.msra.mxu1 %v469_v3  ;;  %v463_v19 = vld [vmem:[#allocation7] sm:$0xff]  ;;  %324 = vmatpush.bf16.msra.mxu2 %v478_v20  ;;  %v477_v21 = vld [vmem:[#allocation8 + $0x30] sm:$0xff]  ;;  %v476_v22 = vld [vmem:[#allocation8 + $0x28] sm:$0xff] }
  0x1a   :  { %v90_v15 = vmax.f32 %v89_v12, 0.0  ;;  %v475_v23 = vld [vmem:[#allocation8 + $0x20] sm:$0xff]  ;;  %v108_v24 = vld [vmem:[%s687_s2] sm:$0x1]  ;;  %v473_v27 = vld [vmem:[#allocation8 + $0x10] sm:$0xff] }
  0x1b   :  { %v474_v25 = vld [vmem:[#allocation8 + $0x18] sm:$0xff]  ;;  %v109_v26 = vunpack.c.l.bf16 %v108_v24  ;;  %v472_v29 = vld [vmem:[#allocation8 + $0x8] sm:$0xff]  ;;  %v471_v35 = vld [vmem:[#allocation8] sm:$0xff] }
  0x1c   :  { %161 = vmatpush.bf16.msra.mxu0 %v460_v4  ;;  %v91_v17 = vpack.c.bf16 %v90_v15, %v90_v15  ;;  %v192_v36 = vld [vmem:[%s689_s4] sm:$0x1]  ;;  %s347_s4 = sshll.u32 %s692_s7, 4  ;;  %s348_s4 = int_to_ptr.hbm [resolvable:$true] %s347_s4 }
  0x1d   :  { %245 = vmatpush.bf16.msra.mxu1 %v468_v5  ;;  %325 = vmatpush.bf16.msra.mxu2 %v477_v21  ;;  %v110_v28 = vperm.slane %v109_v26, 0  ;;  %v193_v37 = vunpack.c.l.bf16 %v192_v36  ;;  %v273_v43 = vld [vmem:[%s691_s6] sm:$0x1] }
  0x1e   :  { %v274_v44 = vunpack.c.l.bf16 %v273_v43 }
  0x1f   :  { %v194_v38 = vperm.slane %v193_v37, 0 }
  0x20   :  { %162 = vmatpush.bf16.msra.mxu0 %v459_v6  ;;  %v275_v45 = vperm.slane %v274_v44, 0 }
  0x21   :  { %246 = vmatpush.bf16.msra.mxu1 %v467_v7  ;;  %326 = vmatpush.bf16.msra.mxu2 %v476_v22 }
  0x24   :  { %163 = vmatpush.bf16.msra.mxu0 %v458_v8 }
  0x25   :  { %247 = vmatpush.bf16.msra.mxu1 %v466_v9  ;;  %327 = vmatpush.bf16.msra.mxu2 %v475_v23 }
  0x28   :  { %164 = vmatpush.bf16.msra.mxu0 %v457_v10 }
  0x29   :  { %248 = vmatpush.bf16.msra.mxu1 %v465_v13  ;;  %328 = vmatpush.bf16.msra.mxu2 %v474_v25 }
  0x2c   :  { %165 = vmatpush.bf16.msra.mxu0 %v456_v14 }
  0x2d   :  { %249 = vmatpush.bf16.msra.mxu1 %v464_v18  ;;  %329 = vmatpush.bf16.msra.mxu2 %v473_v27 }
  0x30   :  { %166 = vmatpush.bf16.msra.mxu0 %v455_v16 }
  0x31   :  { %250 = vmatpush.bf16.msra.mxu1 %v463_v19  ;;  %330 = vmatpush.bf16.msra.mxu2 %v472_v29 }
  0x33   :  { %167 = vmatmul.bf16.vlgmr.msra.gmra.mxu0 %v91_v17 }
  0x35   :  { %331 = vmatpush.bf16.msra.mxu2 %v471_v35 }
  0xb0   :  { %v168_v30 = vpop.f32.mrf.mxu0 }
  0xb1   :  { %v169_v31 = vadd.f32 %v168_v30, %v110_v28 }
  0xb3   :  { %v174_v32 = vmax.f32 %v169_v31, 0.0 }
  0xb5   :  { %v175_v33 = vpack.c.bf16 %v174_v32, %v174_v32 }
  0xb7   :  { %251 = vmatmul.bf16.vlgmr.msra.gmra.mxu1 %v175_v33 }
  0xb8   :  { %v170_v34 = vpop.f32.mrf.mxu0 }
 0x134   :  { %v252_v39 = vpop.f32.mrf.mxu1 }
 0x135   :  { %v253_v40 = vadd.f32 %v252_v39, %v194_v38 }
 0x137   :  { %v256_v41 = vpack.c.bf16 %v253_v40, %v253_v40 }
 0x139   :  { %332 = vmatmul.bf16.vlgmr.msra.gmra.mxu2 %v256_v41 }
 0x13c   :  { %v254_v42 = vpop.f32.mrf.mxu1 }
 0x1bc   :  { %v333_v46 = vpop.f32.mrf.mxu2 }
 0x1bd   :  { %v334_v47 = vadd.f32 %v333_v46, %v275_v45 }
 0x1bf   :  { %v337_v48 = vpack.c.bf16 %v334_v47, %v334_v47 }
 0x1c1   :  { %v338_v49 = vunpack.c.l.bf16 %v337_v48 }
 0x1c3   :  { %339 = vst [vmem:[#allocation10] sm:$0xff] %v338_v49 }
 0x1c4   :  { %v335_v50 = vpop.f32.mrf.mxu2  ;;  %350 = dma.vmem_to_hbm [thread:$0]  %s346_s25, 128, %s348_s4, [#allocation4]  }
 0x1c5   :  { %612 = dma.done.wait [#allocation4], 128  }
 0x1c6   :  { %613 = vsyncadd [#allocation4], 4294967168 }
 0x1c7   :  { %355 = vsyncpa [#allocation3], 1 }
 0x1c8   :  { %356 = vsyncpa [#allocation6], 1 }
 0x1c9   :  { %357 = vsyncpa [#allocation9], 1 }
 0x1ca   :  { %358 = vsyncpa [#allocation4], 1 }

// kernel: tpu_custom_call.1
= control target key start
LH: loop header
LB: loop body
LE: loop exit
PB: predicated region body
PF: predicated region fallthrough
CT: control target
= control target key end

     0   :  { %12 = vsyncpa [#allocation3], 0  ;;  %s685_s0 = inlined_call_operand.hbm [shape: bf16[8,128], index: 0, kind: input, shape index: {}]   ;;  %s686_s1 = inlined_call_operand.hbm [shape: bf16[128,128], index: 1, kind: input, shape index: {}]   ;;  %s687_s2 = inlined_call_operand.vmem [shape: bf16[1,128], index: 2, kind: input, shape index: {}]   ;;  %s688_s3 = inlined_call_operand.hbm [shape: bf16[128,128], index: 3, kind: input, shape index: {}]   ;;  %s689_s4 = inlined_call_operand.vmem [shape: bf16[1,128], index: 4, kind: input, shape index: {}]   ;;  %s690_s5 = inlined_call_operand.hbm [shape: bf16[128,128], index: 5, kind: input, shape index: {}]   ;;  %s691_s6 = inlined_call_operand.vmem [shape: bf16[1,128], index: 6, kind: input, shape index: {}]   ;;  %s692_s7 = inlined_call_operand.hbm [shape: f32[8,128], index: 7, kind: output, shape index: {}]  }
   0x1   :  { %13 = vsyncpa [#allocation6], 0 }
   0x2   :  { %14 = vsyncpa [#allocation9], 0  ;;  %s31_s26 = sshll.u32 %s686_s1, 4  ;;  %s32_s26 = int_to_ptr.hbm [resolvable:$true] %s31_s26 }
   0x3   :  { %15 = vsyncpa [#allocation4], 0  ;;  %s614_s27 = smov [#allocation5]   ;;  %s21_s8 = sshll.u32 %s685_s0, 4  ;;  %s22_s8 = int_to_ptr.hbm [resolvable:$true] %s21_s8 }
   0x4   :  { %s33_s28 = sshll.u32 %s614_s27, 4  ;;  %s615_s9 = smov 64   ;;  %s34_s28 = int_to_ptr.vmem [resolvable:$true] %s33_s28 }
   0x5   :  { %s616_s10 = smov 4   ;;  %s617_s11 = smov [#allocation2]  }
   0x6   :  { %39 = dma.hbm_to_vmem [thread:$0]  %s32_s26, 1024, %s34_s28, [#allocation6], %s615_s9, %s615_s9, %s616_s10  }
   0x7   :  { %s23_s12 = sshll.u32 %s617_s11, 4  ;;  %s46_s15 = sshll.u32 %s688_s3, 4  ;;  %s24_s12 = int_to_ptr.vmem [resolvable:$true] %s23_s12  ;;  %s47_s15 = int_to_ptr.hbm [resolvable:$true] %s46_s15 }
   0x8   :  { %26 = dma.hbm_to_vmem [thread:$0]  %s22_s8, 64, %s24_s12, [#allocation3]  }
   0x9   :  { %s61_s17 = sshll.u32 %s690_s5, 4  ;;  %s618_s18 = smov [#allocation7]   ;;  %s62_s17 = int_to_ptr.hbm [resolvable:$true] %s61_s17 }
   0xa   :  { %s48_s19 = sshll.u32 %s618_s18, 4  ;;  %s619_s0 = smov [#allocation8]   ;;  %s49_s19 = int_to_ptr.vmem [resolvable:$true] %s48_s19 }
   0xb   :  { %54 = dma.hbm_to_vmem [thread:$0]  %s47_s15, 1024, %s49_s19, [#allocation6], %s615_s9, %s615_s9, %s616_s10  }
   0xc   :  { %s63_s20 = sshll.u32 %s619_s0, 4  ;;  %s64_s20 = int_to_ptr.vmem [resolvable:$true] %s63_s20 }
   0xd   :  { %69 = dma.hbm_to_vmem [thread:$0]  %s62_s17, 1024, %s64_s20, [#allocation9], %s615_s9, %s615_s9, %s616_s10  }
   0xe   :  { %606 = dma.done.wait [#allocation3], 64  }
   0xf   :  { %607 = vsyncadd [#allocation3], 4294967232 }
  0x10   :  { %608 = dma.done.wait [#allocation6], 2048  }
  0x11   :  { %609 = vsyncadd [#allocation6], 4294965248 }
  0x12   :  { %610 = dma.done.wait [#allocation9], 1024  }
  0x13   :  { %611 = vsyncadd [#allocation9], 4294966272  ;;  %v462_v0 = vld [vmem:[#allocation5 + $0x38] sm:$0xff]  ;;  %v461_v1 = vld [vmem:[#allocation5 + $0x30] sm:$0xff]  ;;  %s620_s24 = smov [#allocation10]  }
  0x14   :  { %159 = vmatpush.bf16.msra.mxu0 %v462_v0  ;;  %v470_v2 = vld [vmem:[#allocation7 + $0x38] sm:$0xff]  ;;  %v469_v3 = vld [vmem:[#allocation7 + $0x30] sm:$0xff]  ;;  %v460_v4 = vld [vmem:[#allocation5 + $0x28] sm:$0xff]  ;;  %s345_s25 = sshll.u32 %s620_s24, 4  ;;  %s346_s25 = int_to_ptr.vmem [resolvable:$true] %s345_s25 }
  0x15   :  { %243 = vmatpush.bf16.msra.mxu1 %v470_v2  ;;  %v468_v5 = vld [vmem:[#allocation7 + $0x28] sm:$0xff]  ;;  %v459_v6 = vld [vmem:[#allocation5 + $0x20] sm:$0xff]  ;;  %v458_v8 = vld [vmem:[#allocation5 + $0x18] sm:$0xff] }
  0x16   :  { %v467_v7 = vld [vmem:[#allocation7 + $0x20] sm:$0xff]  ;;  %v466_v9 = vld [vmem:[#allocation7 + $0x18] sm:$0xff]  ;;  %v457_v10 = vld [vmem:[#allocation5 + $0x10] sm:$0xff] }
  0x17   :  { %v88_v11 = vld [vmem:[#allocation2] sm:$0xf]  ;;  %v465_v13 = vld [vmem:[#allocation7 + $0x10] sm:$0xff]  ;;  %v456_v14 = vld [vmem:[#allocation5 + $0x8] sm:$0xff] }
  0x18   :  { %160 = vmatpush.bf16.msra.mxu0 %v461_v1  ;;  %v89_v12 = vunpack.c.l.bf16 %v88_v11  ;;  %v455_v16 = vld [vmem:[#allocation5] sm:$0xff]  ;;  %v464_v18 = vld [vmem:[#allocation7 + $0x8] sm:$0xff]  ;;  %v478_v20 = vld [vmem:[#allocation8 + $0x38] sm:$0xff] }
  0x19   :  { %244 = vmatpush.bf16.msra.mxu1 %v469_v3  ;;  %v463_v19 = vld [vmem:[#allocation7] sm:$0xff]  ;;  %324 = vmatpush.bf16.msra.mxu2 %v478_v20  ;;  %v477_v21 = vld [vmem:[#allocation8 + $0x30] sm:$0xff]  ;;  %v476_v22 = vld [vmem:[#allocation8 + $0x28] sm:$0xff] }
  0x1a   :  { %v90_v15 = vmax.f32 %v89_v12, 0.0  ;;  %v475_v23 = vld [vmem:[#allocation8 + $0x20] sm:$0xff]  ;;  %v108_v24 = vld [vmem:[%s687_s2] sm:$0x1]  ;;  %v473_v27 = vld [vmem:[#allocation8 + $0x10] sm:$0xff] }
  0x1b   :  { %v474_v25 = vld [vmem:[#allocation8 + $0x18] sm:$0xff]  ;;  %v109_v26 = vunpack.c.l.bf16 %v108_v24  ;;  %v472_v29 = vld [vmem:[#allocation8 + $0x8] sm:$0xff]  ;;  %v471_v35 = vld [vmem:[#allocation8] sm:$0xff] }
  0x1c   :  { %161 = vmatpush.bf16.msra.mxu0 %v460_v4  ;;  %v91_v17 = vpack.c.bf16 %v90_v15, %v90_v15  ;;  %v192_v36 = vld [vmem:[%s689_s4] sm:$0x1]  ;;  %s347_s4 = sshll.u32 %s692_s7, 4  ;;  %s348_s4 = int_to_ptr.hbm [resolvable:$true] %s347_s4 }
  0x1d   :  { %245 = vmatpush.bf16.msra.mxu1 %v468_v5  ;;  %325 = vmatpush.bf16.msra.mxu2 %v477_v21  ;;  %v110_v28 = vperm.slane %v109_v26, 0  ;;  %v193_v37 = vunpack.c.l.bf16 %v192_v36  ;;  %v273_v43 = vld [vmem:[%s691_s6] sm:$0x1] }
  0x1e   :  { %v274_v44 = vunpack.c.l.bf16 %v273_v43 }
  0x1f   :  { %v194_v38 = vperm.slane %v193_v37, 0 }
  0x20   :  { %162 = vmatpush.bf16.msra.mxu0 %v459_v6  ;;  %v275_v45 = vperm.slane %v274_v44, 0 }
  0x21   :  { %246 = vmatpush.bf16.msra.mxu1 %v467_v7  ;;  %326 = vmatpush.bf16.msra.mxu2 %v476_v22 }
  0x24   :  { %163 = vmatpush.bf16.msra.mxu0 %v458_v8 }
  0x25   :  { %247 = vmatpush.bf16.msra.mxu1 %v466_v9  ;;  %327 = vmatpush.bf16.msra.mxu2 %v475_v23 }
  0x28   :  { %164 = vmatpush.bf16.msra.mxu0 %v457_v10 }
  0x29   :  { %248 = vmatpush.bf16.msra.mxu1 %v465_v13  ;;  %328 = vmatpush.bf16.msra.mxu2 %v474_v25 }
  0x2c   :  { %165 = vmatpush.bf16.msra.mxu0 %v456_v14 }
  0x2d   :  { %249 = vmatpush.bf16.msra.mxu1 %v464_v18  ;;  %329 = vmatpush.bf16.msra.mxu2 %v473_v27 }
  0x30   :  { %166 = vmatpush.bf16.msra.mxu0 %v455_v16 }
  0x31   :  { %250 = vmatpush.bf16.msra.mxu1 %v463_v19  ;;  %330 = vmatpush.bf16.msra.mxu2 %v472_v29 }
  0x33   :  { %167 = vmatmul.bf16.vlgmr.msra.gmra.mxu0 %v91_v17 }
  0x35   :  { %331 = vmatpush.bf16.msra.mxu2 %v471_v35 }
  0xb0   :  { %v168_v30 = vpop.f32.mrf.mxu0 }
  0xb1   :  { %v169_v31 = vadd.f32 %v168_v30, %v110_v28 }
  0xb3   :  { %v174_v32 = vmax.f32 %v169_v31, 0.0 }
  0xb5   :  { %v175_v33 = vpack.c.bf16 %v174_v32, %v174_v32 }
  0xb7   :  { %251 = vmatmul.bf16.vlgmr.msra.gmra.mxu1 %v175_v33 }
  0xb8   :  { %v170_v34 = vpop.f32.mrf.mxu0 }
 0x134   :  { %v252_v39 = vpop.f32.mrf.mxu1 }
 0x135   :  { %v253_v40 = vadd.f32 %v252_v39, %v194_v38 }
 0x137   :  { %v256_v41 = vpack.c.bf16 %v253_v40, %v253_v40 }
 0x139   :  { %332 = vmatmul.bf16.vlgmr.msra.gmra.mxu2 %v256_v41 }
 0x13c   :  { %v254_v42 = vpop.f32.mrf.mxu1 }
 0x1bc   :  { %v333_v46 = vpop.f32.mrf.mxu2 }
 0x1bd   :  { %v334_v47 = vadd.f32 %v333_v46, %v275_v45 }
 0x1bf   :  { %v337_v48 = vpack.c.bf16 %v334_v47, %v334_v47 }
 0x1c1   :  { %v338_v49 = vunpack.c.l.bf16 %v337_v48 }
 0x1c3   :  { %339 = vst [vmem:[#allocation10] sm:$0xff] %v338_v49 }
 0x1c4   :  { %v335_v50 = vpop.f32.mrf.mxu2  ;;  %350 = dma.vmem_to_hbm [thread:$0]  %s346_s25, 128, %s348_s4, [#allocation4]  }
 0x1c5   :  { %612 = dma.done.wait [#allocation4], 128  }
 0x1c6   :  { %613 = vsyncadd [#allocation4], 4294967168 }
 0x1c7   :  { %355 = vsyncpa [#allocation3], 1 }
 0x1c8   :  { %356 = vsyncpa [#allocation6], 1 }
 0x1c9   :  { %357 = vsyncpa [#allocation9], 1 }
 0x1ca   :  { %358 = vsyncpa [#allocation4], 1 }

</bundles_post_ra>
